<compile_context>
chip_gen: v7x
topology: tpu7x:2x2x1
jax: 0.10.0
libtpu: 0.0.40
codegen_flags: <defaults>
</compile_context>

<pallas_src>
import functools

import jax
import jax.numpy as jnp
import numpy as np
from jax.experimental import pallas as pl
from jax.experimental.pallas import tpu as pltpu

LANE = 128  # lane width / padded feature width


def _round_up(x, m):
    return ((x + m - 1) // m) * m


# ----------------------------------------------------------------------------
# Pallas kernel: fused 4-layer MLP (tanh, tanh, relu, linear) on one batch tile.
# x_ref : (bb, zdim)       -- last time-step tile, selected by the BlockSpec
# w_ref : (4, 128, 128)     packed weights, (in, out) layout, zero padded
# b_ref : (4, 128)          packed biases, zero padded
# out   : (bb, 128)         lane-dense logits (cols >= n_actions are exactly 0)
# ----------------------------------------------------------------------------
def _make_actor_kernel(zdim):
    def kernel(x_ref, w_ref, b_ref, out_ref):
        x = x_ref[...]                                              # (bb, zdim)
        # Layer 1: static sublane slice (zdim is a multiple of 8), all 128
        # lanes -> unmasked loads; output is already a full (bb, 128) slab.
        h = jnp.tanh(
            jnp.dot(x, w_ref[0, :zdim, :], preferred_element_type=jnp.float32)
            + b_ref[0:1, :])
        # Layers 2-4: full 128x128 weight slabs, full 128-lane biases.  Padded
        # weight rows/cols and zero bias padding keep padded activation
        # columns exactly 0 through tanh/relu -> real columns bit-identical.
        h = jnp.tanh(
            jnp.dot(h, w_ref[1], preferred_element_type=jnp.float32)
            + b_ref[1:2, :])
        h = jnp.maximum(
            jnp.dot(h, w_ref[2], preferred_element_type=jnp.float32)
            + b_ref[2:3, :],
            0.0)
        out_ref[...] = (
            jnp.dot(h, w_ref[3], preferred_element_type=jnp.float32)
            + b_ref[3:4, :])
    return kernel


@functools.partial(jax.jit, static_argnames=("block_b",))
def actor_forward(x, w_packed, b_packed, block_b=None):
    """x: (T, B, zdim) f32.  Returns lane-dense padded logits (B, 128)."""
    T, B, zdim = x.shape
    n_pad = w_packed.shape[-1]

    # Batch tile: multiple of 8 sublanes so in-kernel stores are unmasked;
    # grid over B amortizes launch overhead and (on v7x) shards across TCs.
    if block_b is None:
        block_b = min(256, _round_up(B, 8))
    grid = (pl.cdiv(B, block_b),)

    kernel = _make_actor_kernel(zdim)

    logits_padded = pl.pallas_call(
        kernel,
        out_shape=jax.ShapeDtypeStruct((B, n_pad), jnp.float32),
        grid=grid,
        in_specs=[
            # Time-selection happens here: only the last (block_b, zdim) slab
            # per grid step is DMA'd from HBM.
            pl.BlockSpec((pl.Squeezed(), block_b, zdim),
                         lambda i: (T - 1, i, 0)),
            # Constant block index: weight/bias slabs DMA'd once, VMEM-resident
            # across all grid steps.
            pl.BlockSpec(w_packed.shape, lambda i: (0, 0, 0)),
            pl.BlockSpec(b_packed.shape, lambda i: (0, 0)),
        ],
        out_specs=pl.BlockSpec((block_b, n_pad), lambda i: (i, 0)),
        compiler_params=pltpu.CompilerParams(
            dimension_semantics=("parallel",)),
    )(x, w_packed, b_packed)

    # Padded buffer is returned as-is; the per-action-group split is done by
    # the consumer against the padded layout (mirrors update_logits storing
    # views), so there is no extra narrowing dispatch on the hot path.
    return logits_padded


# ----------------------------------------------------------------------------
# Parameter init (PyTorch Linear-style uniform(-1/sqrt(fan_in))) + one-time
# packing into the kernel layout: transposed to (in, out), zero padded to
# (4, 128, 128) / (4, 128).
# ----------------------------------------------------------------------------
def init_params(key, zdim, action_shape):
    latent = zdim // 2
    dims = [(zdim, latent),                                # shared linear 1
            (latent, latent),                              # shared linear 2
            (latent, latent // 2),                         # actor linear 1
            (latent // 2, int(np.sum(action_shape)))]      # actor linear 2
    params = []
    for fan_in, fan_out in dims:
        key, kw, kb = jax.random.split(key, 3)
        bound = 1.0 / np.sqrt(fan_in)
        w = jax.random.uniform(kw, (fan_out, fan_in), jnp.float32, -bound, bound)
        b = jax.random.uniform(kb, (fan_out,), jnp.float32, -bound, bound)
        params.append((w, b))
    return params


def pack_params(params, zdim, action_shape):
    """One-time packing: 4 weights -> (4, P, P), 4 biases -> (4, P), P>=128."""
    lat = zdim // 2
    half = lat // 2
    n_actions = int(np.sum(action_shape))
    n_pad = _round_up(max(zdim, lat, half, n_actions, LANE), LANE)
    (w1, b1), (w2, b2), (w3, b3), (w4, b4) = params   # torch layout (out, in)

    W = jnp.zeros((4, n_pad, n_pad), jnp.float32)
    W = W.at[0, :zdim, :lat].set(w1.T)
    W = W.at[1, :lat, :lat].set(w2.T)
    W = W.at[2, :lat, :half].set(w3.T)
    W = W.at[3, :half, :n_actions].set(w4.T)

    Bp = jnp.zeros((4, n_pad), jnp.float32)
    Bp = Bp.at[0, :lat].set(b1)
    Bp = Bp.at[1, :lat].set(b2)
    Bp = Bp.at[2, :half].set(b3)
    Bp = Bp.at[3, :n_actions].set(b4)
    return W, Bp


def reference_forward(x, params):
    """Plain-JAX reference (mirrors the PyTorch module) for sanity checking."""
    (w1, b1), (w2, b2), (w3, b3), (w4, b4) = params
    h = jnp.tanh(x @ w1.T + b1)
    h = jnp.tanh(h @ w2.T + b2)
    h = h[-1]                                   # shared(inputs)[-1]
    h = jnp.maximum(h @ w3.T + b3, 0.0)
    return h @ w4.T + b4


if __name__ == "__main__":
    T, B, ZDIM = 8, 2, 32
    ACTION_SHAPE = (3, 4, 5)          # MultiDiscrete nvec; sum = 12 logits
    N_ACTIONS = int(np.sum(ACTION_SHAPE))

    key = jax.random.PRNGKey(0)
    kx, kp = jax.random.split(key)
    x = jax.random.normal(kx, (T, B, ZDIM), jnp.float32)

    raw_params = init_params(kp, ZDIM, ACTION_SHAPE)
    w_packed, b_packed = pack_params(raw_params, ZDIM, ACTION_SHAPE)

    logits_padded = actor_forward(x, w_packed, b_packed)
    logits_padded = jax.block_until_ready(logits_padded)
    assert logits_padded.shape == (B, LANE)

    ref = reference_forward(x, raw_params)
    np.testing.assert_allclose(np.asarray(logits_padded)[:, :N_ACTIONS],
                               np.asarray(ref), rtol=1e-5, atol=1e-5)
    # The padding scheme guarantees the lane-padded tail is exactly zero.
    np.testing.assert_array_equal(np.asarray(logits_padded)[:, N_ACTIONS:], 0.0)

    # MultiCategorical.update_logits equivalent: per-group slices are taken
    # directly against the padded layout (consumer-side, no extra kernel).
    # TODO(synk): Categorical sampling / log_prob / entropy are distribution
    # ops, not part of forward() tensor compute, and are left to the consumer.
    offs = np.concatenate([[0], np.cumsum(ACTION_SHAPE)]).astype(int)
    group_logits = [logits_padded[:, offs[i]:offs[i + 1]]
                    for i in range(len(ACTION_SHAPE))]
    assert [g.shape[1] for g in group_logits] == list(ACTION_SHAPE)

    print("KERNEL_OK")
</pallas_src>

<mosaic_0001>
module attributes {stable_mosaic.version = 11 : i64} {
  func.func @kernel(%arg0: i32, %arg1: memref<1x8x32xf32, #tpu.memory_space<vmem>>, %arg2: memref<4x128x128xf32, #tpu.memory_space<vmem>>, %arg3: memref<4x128xf32, #tpu.memory_space<vmem>>, %arg4: memref<8x128xf32, #tpu.memory_space<vmem>>) attributes {dimension_semantics = [#tpu.dimension_semantics<parallel>], iteration_bounds = array<i64: 1>, scalar_prefetch = 0 : i64, scratch_operands = 0 : i64, tpu.core_type = #tpu.core_type<tc>, window_params = [{transform_indices = @transform_0, window_bounds = array<i64: 1, 8, 32>}, {pipeline_mode = #tpu.pipeline_mode<synchronous>, transform_indices = @transform_1, window_bounds = array<i64: 4, 128, 128>}, {pipeline_mode = #tpu.pipeline_mode<synchronous>, transform_indices = @transform_2, window_bounds = array<i64: 4, 128>}, {transform_indices = @transform_3, window_bounds = array<i64: 8, 128>}]} {
    %c0 = arith.constant 0 : index
    %c0_0 = arith.constant 0 : index
    %c0_1 = arith.constant 0 : index
    %0 = vector.load %arg1[%c0, %c0_0, %c0_1] : memref<1x8x32xf32, #tpu.memory_space<vmem>>, vector<1x8x32xf32>
    %1 = vector.shape_cast %0 : vector<1x8x32xf32> to vector<8x32xf32>
    %c0_2 = arith.constant 0 : index
    %c0_3 = arith.constant 0 : index
    %c0_4 = arith.constant 0 : index
    %2 = vector.load %arg2[%c0_2, %c0_3, %c0_4] : memref<4x128x128xf32, #tpu.memory_space<vmem>>, vector<1x32x128xf32>
    %3 = vector.shape_cast %2 : vector<1x32x128xf32> to vector<32x128xf32>
    %cst = arith.constant dense<0.000000e+00> : vector<8x128xf32>
    %4 = tpu.matmul %1, %3, %cst {dimension_numbers = #tpu.dot_dimension_numbers<[1], [0], [0], [1], [0, 0, 1, 1], [], []>} : vector<8x32xf32>, vector<32x128xf32>, vector<8x128xf32> -> vector<8x128xf32>
    %c0_5 = arith.constant 0 : index
    %c0_6 = arith.constant 0 : index
    %5 = vector.load %arg3[%c0_5, %c0_6] : memref<4x128xf32, #tpu.memory_space<vmem>>, vector<1x128xf32>
    %6 = vector.broadcast %5 : vector<1x128xf32> to vector<8x128xf32>
    %7 = arith.addf %4, %6 : vector<8x128xf32>
    %8 = math.tanh %7 : vector<8x128xf32>
    %c1 = arith.constant 1 : index
    %c0_7 = arith.constant 0 : index
    %c0_8 = arith.constant 0 : index
    %9 = vector.load %arg2[%c1, %c0_7, %c0_8] : memref<4x128x128xf32, #tpu.memory_space<vmem>>, vector<1x128x128xf32>
    %10 = vector.shape_cast %9 : vector<1x128x128xf32> to vector<128x128xf32>
    %cst_9 = arith.constant dense<0.000000e+00> : vector<8x128xf32>
    %11 = tpu.matmul %8, %10, %cst_9 {dimension_numbers = #tpu.dot_dimension_numbers<[1], [0], [0], [1], [0, 0, 1, 1], [], []>} : vector<8x128xf32>, vector<128x128xf32>, vector<8x128xf32> -> vector<8x128xf32>
    %c1_10 = arith.constant 1 : index
    %c0_11 = arith.constant 0 : index
    %12 = vector.load %arg3[%c1_10, %c0_11] : memref<4x128xf32, #tpu.memory_space<vmem>>, vector<1x128xf32>
    %13 = vector.broadcast %12 : vector<1x128xf32> to vector<8x128xf32>
    %14 = arith.addf %11, %13 : vector<8x128xf32>
    %15 = math.tanh %14 : vector<8x128xf32>
    %c2 = arith.constant 2 : index
    %c0_12 = arith.constant 0 : index
    %c0_13 = arith.constant 0 : index
    %16 = vector.load %arg2[%c2, %c0_12, %c0_13] : memref<4x128x128xf32, #tpu.memory_space<vmem>>, vector<1x128x128xf32>
    %17 = vector.shape_cast %16 : vector<1x128x128xf32> to vector<128x128xf32>
    %cst_14 = arith.constant dense<0.000000e+00> : vector<8x128xf32>
    %18 = tpu.matmul %15, %17, %cst_14 {dimension_numbers = #tpu.dot_dimension_numbers<[1], [0], [0], [1], [0, 0, 1, 1], [], []>} : vector<8x128xf32>, vector<128x128xf32>, vector<8x128xf32> -> vector<8x128xf32>
    %c2_15 = arith.constant 2 : index
    %c0_16 = arith.constant 0 : index
    %19 = vector.load %arg3[%c2_15, %c0_16] : memref<4x128xf32, #tpu.memory_space<vmem>>, vector<1x128xf32>
    %20 = vector.broadcast %19 : vector<1x128xf32> to vector<8x128xf32>
    %21 = arith.addf %18, %20 : vector<8x128xf32>
    %cst_17 = arith.constant 0.000000e+00 : f32
    %22 = vector.broadcast %cst_17 : f32 to vector<8x128xf32>
    %23 = arith.maximumf %21, %22 : vector<8x128xf32>
    %c3 = arith.constant 3 : index
    %c0_18 = arith.constant 0 : index
    %c0_19 = arith.constant 0 : index
    %24 = vector.load %arg2[%c3, %c0_18, %c0_19] : memref<4x128x128xf32, #tpu.memory_space<vmem>>, vector<1x128x128xf32>
    %25 = vector.shape_cast %24 : vector<1x128x128xf32> to vector<128x128xf32>
    %cst_20 = arith.constant dense<0.000000e+00> : vector<8x128xf32>
    %26 = tpu.matmul %23, %25, %cst_20 {dimension_numbers = #tpu.dot_dimension_numbers<[1], [0], [0], [1], [0, 0, 1, 1], [], []>} : vector<8x128xf32>, vector<128x128xf32>, vector<8x128xf32> -> vector<8x128xf32>
    %c3_21 = arith.constant 3 : index
    %c0_22 = arith.constant 0 : index
    %27 = vector.load %arg3[%c3_21, %c0_22] : memref<4x128xf32, #tpu.memory_space<vmem>>, vector<1x128xf32>
    %28 = vector.broadcast %27 : vector<1x128xf32> to vector<8x128xf32>
    %29 = arith.addf %26, %28 : vector<8x128xf32>
    %c0_23 = arith.constant 0 : index
    %c0_24 = arith.constant 0 : index
    %30 = vector.load %arg4[%c0_23, %c0_24] : memref<8x128xf32, #tpu.memory_space<vmem>>, vector<8x128xf32>
    tpu.vector_store %arg4[%c0_23, %c0_24], %29 {strides = array<i32>} : memref<8x128xf32, #tpu.memory_space<vmem>>, vector<8x128xf32>,
    return
  }
  func.func @transform_0(%arg0: i32) -> (i32, i32, i32) {
    %c7_i32 = arith.constant 7 : i32
    %c0_i32 = arith.constant 0 : i32
    %c0_i32_0 = arith.constant 0 : i32
    return %c7_i32, %arg0, %c0_i32 : i32, i32, i32
  }
  func.func @transform_1(%arg0: i32) -> (i32, i32, i32) {
    %c0_i32 = arith.constant 0 : i32
    %c0_i32_0 = arith.constant 0 : i32
    %c0_i32_1 = arith.constant 0 : i32
    %c0_i32_2 = arith.constant 0 : i32
    return %c0_i32, %c0_i32_0, %c0_i32_1 : i32, i32, i32
  }
  func.func @transform_2(%arg0: i32) -> (i32, i32) {
    %c0_i32 = arith.constant 0 : i32
    %c0_i32_0 = arith.constant 0 : i32
    %c0_i32_1 = arith.constant 0 : i32
    return %c0_i32, %c0_i32_0 : i32, i32
  }
  func.func @transform_3(%arg0: i32) -> (i32, i32) {
    %c0_i32 = arith.constant 0 : i32
    %c0_i32_0 = arith.constant 0 : i32
    return %arg0, %c0_i32 : i32, i32
  }
}

</mosaic_0001>

<bundles_post_ra>
// kernel: actor_forward.1
= control target key start
LH: loop header
LB: loop body
LE: loop exit
PB: predicated region body
PF: predicated region fallthrough
CT: control target
= control target key end

     0   :  { %8 = vsyncpa [#allocation3], 0  ;;  %s885_s0 = inlined_call_operand.hbm [shape: f32[8,2,32], index: 0, kind: input, shape index: {}]   ;;  %s886_s1 = inlined_call_operand.hbm [shape: f32[4,128,128], index: 1, kind: input, shape index: {}]   ;;  %s887_s2 = inlined_call_operand.vmem [shape: f32[4,128], index: 2, kind: input, shape index: {}]   ;;  %s888_s3 = inlined_call_operand.hbm [shape: f32[2,128], index: 3, kind: output, shape index: {}]  }
   0x1   :  { %9 = vsyncpa [#allocation6], 0 }
   0x2   :  { %10 = vsyncpa [#allocation4], 0 }
   0x3   :  { %15 = vsyncadd [#allocation3], 96  ;;  %s16_s14 = scalar_lea.hbm %s885_s0, 224  ;;  %s770_s15 = smov [#allocation2]  }
   0x4   :  { %s17_s16 = sshll.u32 %s770_s15, 4  ;;  %s719_s19 = scalar_lea.hbm %s885_s0, 256  ;;  %s18_s16 = int_to_ptr.vmem [resolvable:$true] %s17_s16 }
   0x5   :  { %p696_p0 = scmp.ne.s32.totalorder %s16_s14, %s719_s19  ;;  %p698_p1 = scmp.lt.u32.totalorder %s16_s14, %s885_s0 }
   0x6   :  { %p699_p2 = scmp.lt.u32.totalorder %s719_s19, %s719_s19  ;;  %p701_p4 = scmp.lt.u32.totalorder %s719_s19, %s16_s14 }
   0x8   :  { %p700_p3 = por %p699_p2, %p698_p1 }
   0xa   :  { %p702_p5 = por %p701_p4, %p700_p3 }
   0xc   :  { %p703_p6 = pnand %p702_p5, %p696_p0 }
   0xe   :  { %706 = shalt.err (!%p703_p6)
}
   0xf   :  { %s707_s22 = scalar_lea.vmem %s18_s16, 32  ;;  %s711_s23 = scalar_lea.vmem %s18_s16, 128 }
  0x10   :  { %p708_p7 = scmp.ne.s32.totalorder %s18_s16, %s707_s22  ;;  %p712_p8 = scmp.lt.s32.totalorder %s18_s16, %s18_s16 }
  0x11   :  { %p713_p9 = scmp.lt.s32.totalorder %s711_s23, %s707_s22 }
  0x13   :  { %p714_p10 = por %p713_p9, %p712_p8 }
  0x15   :  { %p715_p11 = pnand %p714_p10, %p708_p7 }
  0x17   :  { %718 = shalt.err (!%p715_p11)
}
  0x18   :  { %s771_s24 = smov 32   ;;  %s772_s25 = smov 2  }
  0x19   :  { %23 = dma.hbm_to_vmem [thread:$0]  %s16_s14, 32, %s18_s16, [#allocation3], %s771_s24, %s771_s24, %s772_s25  }
  0x1a   :  { %s773_s0 = smov [#allocation5]   ;;  %s720_s29 = scalar_lea.hbm %s886_s1, 8192 }
  0x1b   :  { %s29_s26 = sshll.u32 %s773_s0, 4  ;;  %p721_p12 = scmp.ne.s32.totalorder %s886_s1, %s720_s29  ;;  %s30_s26 = int_to_ptr.vmem [resolvable:$true] %s29_s26 }
  0x1c   :  { %p724_p13 = scmp.lt.u32.totalorder %s720_s29, %s886_s1 }
  0x1e   :  { %p726_p0 = pnand %p724_p13, %p721_p12 }
  0x20   :  { %729 = shalt.err (!%p726_p0)
}
  0x21   :  { %s730_s7 = scalar_lea.vmem %s30_s26, 8192  ;;  %p735_p2 = scmp.lt.s32.totalorder %s30_s26, %s30_s26 }
  0x22   :  { %p731_p1 = scmp.ne.s32.totalorder %s30_s26, %s730_s7  ;;  %p736_p3 = scmp.lt.s32.totalorder %s730_s7, %s730_s7 }
  0x24   :  { %p737_p4 = por %p736_p3, %p735_p2 }
  0x26   :  { %p738_p5 = pnand %p737_p4, %p731_p1 }
  0x28   :  { %741 = shalt.err (!%p738_p5)
}
  0x29   :  { %s774_s8 = smov 128   ;;  %s775_s9 = smov 8  }
  0x2a   :  { %35 = dma.hbm_to_vmem [thread:$0]  %s886_s1, 8192, %s30_s26, [#allocation6], %s774_s8, %s774_s8, %s775_s9  }
  0x2b   :  { %764 = dma.done.wait [#allocation3], 128  }
  0x2c   :  { %765 = vsyncadd [#allocation3], 4294967168 }
  0x2d   :  { %766 = dma.done.wait [#allocation6], 8192  }
  0x2e   :  { %767 = vsyncadd [#allocation6], 4294959104  ;;  %v776_v0 = vmov 0.0|0.0   ;;  %vm777_vm0 = vmmov 0   ;;  %v778_v1 = vmov 0.0   ;;  %v45_v2 = vld [vmem:[#allocation5] sm:$0xff] }
  0x2f   :  { %603 = vmatprep.subr.bf16.mxu0 %v776_v0  ;;  %495 = vmatprep.mubr.msk.f32.mxu0 %vm777_vm0, %v778_v1  ;;  %v46_v3 = vld [vmem:[#allocation5 + $0x8] sm:$0xff]  ;;  %v47_v4 = vld [vmem:[#allocation5 + $0x10] sm:$0xff]  ;;  %v48_v6 = vld [vmem:[#allocation5 + $0x18] sm:$0xff]  ;;  %vm54_vm1 = vcmask 261120  }
  0x30   :  { %609 = vmatprep.subr.bf16.mxu1 %v776_v0  ;;  %530 = vmatprep.mubr.msk.f32.mxu1 %vm777_vm0, %v778_v1  ;;  %v604_v5 = vpack.c.bf16 %v46_v3, %v45_v2  ;;  %v130_v7 = vld [vmem:[#allocation5 + $0x80] sm:$0xff]  ;;  %v131_v8 = vld [vmem:[#allocation5 + $0x88] sm:$0xff]  ;;  %v132_v9 = vld [vmem:[#allocation5 + $0x90] sm:$0xff]  ;;  %v607_v11 = vpack.c.bf16 %v48_v6, %v47_v4 }
  0x31   :  { %v133_v10 = vld [vmem:[#allocation5 + $0x98] sm:$0xff]  ;;  %v610_v12 = vpack.c.bf16 %v131_v8, %v130_v7  ;;  %v134_v14 = vld [vmem:[#allocation5 + $0xa0] sm:$0xff]  ;;  %v135_v15 = vld [vmem:[#allocation5 + $0xa8] sm:$0xff] }
  0x32   :  { %605 = vmatpush3.bf16.msra.mxu0 %v604_v5  ;;  %v613_v13 = vpack.c.bf16 %v133_v10, %v132_v9  ;;  %v44_v16 = vld [vmem:[#allocation2] sm:$0xff]  ;;  %v616_v17 = vpack.c.bf16 %v135_v15, %v134_v14  ;;  %v136_v18 = vld [vmem:[#allocation5 + $0xb0] sm:$0xff]  ;;  %v138_v21 = vld [vmem:[#allocation5 + $0xc0] sm:$0xff] }
  0x33   :  { %606 = vmatprep.subr.bf16.mxu0 %v776_v0  ;;  %611 = vmatpush3.bf16.msra.mxu1 %v610_v12  ;;  %v137_v19 = vld [vmem:[#allocation5 + $0xb8] sm:$0xff]  ;;  %v139_v22 = vld [vmem:[#allocation5 + $0xc8] sm:$0xff]  ;;  %v140_v24 = vld [vmem:[#allocation5 + $0xd0] sm:$0xff] }
  0x34   :  { %612 = vmatprep.subr.bf16.mxu1 %v776_v0  ;;  %v619_v20 = vpack.c.bf16 %v137_v19, %v136_v18  ;;  %v622_v23 = vpack.c.bf16 %v139_v22, %v138_v21  ;;  %v141_v25 = vld [vmem:[#allocation5 + $0xd8] sm:$0xff]  ;;  %v142_v27 = vld [vmem:[#allocation5 + $0xe0] sm:$0xff]  ;;  %v143_v28 = vld [vmem:[#allocation5 + $0xe8] sm:$0xff] }
  0x35   :  { %v625_v26 = vpack.c.bf16 %v141_v25, %v140_v24  ;;  %v628_v29 = vpack.c.bf16 %v143_v28, %v142_v27  ;;  %v144_v30 = vld [vmem:[#allocation5 + $0xf0] sm:$0xff]  ;;  %v145_v31 = vld [vmem:[#allocation5 + $0xf8] sm:$0xff]  ;;  %v223_v33 = vld [vmem:[#allocation5 + $0x100] sm:$0xff] }
  0x36   :  { %608 = vmatpush3.bf16.msra.mxu0 %v607_v11  ;;  %v631_v32 = vpack.c.bf16 %v145_v31, %v144_v30  ;;  %v224_v34 = vld [vmem:[#allocation5 + $0x108] sm:$0xff]  ;;  %v225_v35 = vld [vmem:[#allocation5 + $0x110] sm:$0xff]  ;;  %v226_v37 = vld [vmem:[#allocation5 + $0x118] sm:$0xff] }
  0x37   :  { %633 = vmatprep.subr.bf16.mxu0 %v776_v0  ;;  %614 = vmatpush3.bf16.msra.mxu1 %v613_v13  ;;  %v634_v36 = vpack.c.bf16 %v224_v34, %v223_v33  ;;  %v637_v38 = vpack.c.bf16 %v226_v37, %v225_v35  ;;  %v227_v39 = vld [vmem:[#allocation5 + $0x120] sm:$0xff]  ;;  %v228_v40 = vld [vmem:[#allocation5 + $0x128] sm:$0xff]  ;;  %v229_v42 = vld [vmem:[#allocation5 + $0x130] sm:$0xff] }
  0x38   :  { %615 = vmatprep.subr.bf16.mxu1 %v776_v0  ;;  %v640_v41 = vpack.c.bf16 %v228_v40, %v227_v39  ;;  %v230_v43 = vld [vmem:[#allocation5 + $0x138] sm:$0xff]  ;;  %v231_v45 = vld [vmem:[#allocation5 + $0x140] sm:$0xff]  ;;  %v232_v46 = vld [vmem:[#allocation5 + $0x148] sm:$0xff] }
  0x39   :  { %496 = vmatmul.mubr.msk.f32.vlgmr.msra.gmra.mrb[0].mxu0 %vm54_vm1, %v44_v16  ;;  %v643_v44 = vpack.c.bf16 %v230_v43, %v229_v42  ;;  %v646_v47 = vpack.c.bf16 %v232_v46, %v231_v45  ;;  %v426_v48 = vld [vmem:[%s887_s2] ss:$0 sm:$0xff]  ;;  %v233_v53 = vld [vmem:[#allocation5 + $0x150] sm:$0xff]  ;;  %v235_v56 = vld [vmem:[#allocation5 + $0x160] sm:$0xff] }
  0x3a   :  { %565 = vmatprep.mubr.msk.f32.mxu0 %vm777_vm0, %v778_v1  ;;  %635 = vmatpush3.bf16.msra.mxu0 %v634_v36  ;;  %v234_v54 = vld [vmem:[#allocation5 + $0x158] sm:$0xff]  ;;  %v236_v57 = vld [vmem:[#allocation5 + $0x168] sm:$0xff]  ;;  %v237_v59 = vld [vmem:[#allocation5 + $0x170] sm:$0xff] }
  0x3b   :  { %617 = vmatpush3.bf16.msra.mxu1 %v616_v17  ;;  %636 = vmatprep.subr.bf16.mxu0 %v776_v0  ;;  %v649_v55 = vpack.c.bf16 %v234_v54, %v233_v53  ;;  %v652_v58 = vpack.c.bf16 %v236_v57, %v235_v56  ;;  %v238_v60 = vld [vmem:[#allocation5 + $0x178] sm:$0xff]  ;;  %v316_v62 = vld [vmem:[#allocation5 + $0x180] sm:$0xff]  ;;  %v317_v63 = vld [vmem:[#allocation5 + $0x188] sm:$0xff] }
  0x3c   :  { %618 = vmatprep.subr.bf16.mxu1 %v776_v0  ;;  %v655_v61 = vpack.c.bf16 %v238_v60, %v237_v59  ;;  %v318_v2 = vld [vmem:[#allocation5 + $0x190] sm:$0xff]  ;;  %v319_v3 = vld [vmem:[#allocation5 + $0x198] sm:$0xff]  ;;  %v320_v5 = vld [vmem:[#allocation5 + $0x1a0] sm:$0xff] }
  0x3d   :  { %v661_v4 = vpack.c.bf16 %v319_v3, %v318_v2  ;;  %v321_v6 = vld [vmem:[#allocation5 + $0x1a8] sm:$0xff]  ;;  %v322_v8 = vld [vmem:[#allocation5 + $0x1b0] sm:$0xff]  ;;  %v323_v9 = vld [vmem:[#allocation5 + $0x1b8] sm:$0xff] }
  0x3e   :  { %638 = vmatpush3.bf16.msra.mxu0 %v637_v38  ;;  %v664_v7 = vpack.c.bf16 %v321_v6, %v320_v5  ;;  %v667_v10 = vpack.c.bf16 %v323_v9, %v322_v8  ;;  %v324_v11 = vld [vmem:[#allocation5 + $0x1c0] sm:$0xff]  ;;  %v325_v12 = vld [vmem:[#allocation5 + $0x1c8] sm:$0xff]  ;;  %v326_v14 = vld [vmem:[#allocation5 + $0x1d0] sm:$0xff] }
  0x3f   :  { %620 = vmatpush3.bf16.msra.mxu1 %v619_v20  ;;  %639 = vmatprep.subr.bf16.mxu0 %v776_v0  ;;  %v670_v13 = vpack.c.bf16 %v325_v12, %v324_v11  ;;  %v327_v15 = vld [vmem:[#allocation5 + $0x1d8] sm:$0xff]  ;;  %v328_v17 = vld [vmem:[#allocation5 + $0x1e0] sm:$0xff]  ;;  %v329_v18 = vld [vmem:[#allocation5 + $0x1e8] sm:$0xff] }
  0x40   :  { %621 = vmatprep.subr.bf16.mxu1 %v776_v0  ;;  %v673_v16 = vpack.c.bf16 %v327_v15, %v326_v14  ;;  %v676_v19 = vpack.c.bf16 %v329_v18, %v328_v17  ;;  %v428_v20 = vld [vmem:[%s887_s2 + $0x1] ss:$0 sm:$0xff]  ;;  %v330_v25 = vld [vmem:[#allocation5 + $0x1f0] sm:$0xff]  ;;  %v429_v28 = vld [vmem:[%s887_s2 + $0x2] ss:$0 sm:$0xff] }
  0x42   :  { %641 = vmatpush3.bf16.msra.mxu0 %v640_v41 }
  0x43   :  { %623 = vmatpush3.bf16.msra.mxu1 %v622_v23  ;;  %642 = vmatprep.subr.bf16.mxu0 %v776_v0 }
  0x44   :  { %624 = vmatprep.subr.bf16.mxu1 %v776_v0 }
  0x46   :  { %644 = vmatpush3.bf16.msra.mxu0 %v643_v44 }
  0x47   :  { %626 = vmatpush3.bf16.msra.mxu1 %v625_v26  ;;  %645 = vmatprep.subr.bf16.mxu0 %v776_v0  ;;  %v331_v26 = vld [vmem:[#allocation5 + $0x1f8] sm:$0xff] }
  0x48   :  { %627 = vmatprep.subr.bf16.mxu1 %v776_v0  ;;  %v679_v27 = vpack.c.bf16 %v331_v26, %v330_v25 }
  0x4a   :  { %647 = vmatpush3.bf16.msra.mxu0 %v646_v47 }
  0x4b   :  { %629 = vmatpush3.bf16.msra.mxu1 %v628_v29  ;;  %648 = vmatprep.subr.bf16.mxu0 %v776_v0 }
  0x4c   :  { %630 = vmatprep.subr.bf16.mxu1 %v776_v0 }
  0x4e   :  { %650 = vmatpush3.bf16.msra.mxu0 %v649_v55 }
  0x4f   :  { %632 = vmatpush3.bf16.msra.mxu1 %v631_v32  ;;  %651 = vmatprep.subr.bf16.mxu0 %v776_v0  ;;  %v430_v32 = vld [vmem:[%s887_s2 + $0x3] ss:$0 sm:$0xff] }
  0x50   :  { %657 = vmatprep.subr.bf16.mxu1 %v776_v0 }
  0x52   :  { %653 = vmatpush3.bf16.msra.mxu0 %v652_v58 }
  0x53   :  { %654 = vmatprep.subr.bf16.mxu0 %v776_v0 }
  0x56   :  { %656 = vmatpush3.bf16.msra.mxu0 %v655_v61 }
 0x10c   :  { %v124_v49 = vpop.f32.mrb[0].mxu0 }
 0x10d   :  { %v125_v50 = vadd.f32 %v426_v48, %v124_v49  ;;  %v497_v51 = vpop.f32.mrb[1].mxu0 }
 0x10f   :  { %691 = vtanh.f32 %v125_v50 }
 0x119   :  { %v692_v52 = vpop.eup %691 }
 0x11a   :  { %531 = vmatmul.mubr.f32.vlgmr.msra.gmra.mrb[0].mxu1 %v692_v52 }
 0x11b   :  { %600 = vmatprep.mubr.msk.f32.mxu1 %vm777_vm0, %v778_v1  ;;  %v658_v1 = vpack.c.bf16 %v317_v63, %v316_v62 }
 0x11d   :  { %659 = vmatpush3.bf16.msra.mxu1 %v658_v1 }
 0x11e   :  { %660 = vmatprep.subr.bf16.mxu1 %v776_v0 }
 0x121   :  { %662 = vmatpush3.bf16.msra.mxu1 %v661_v4 }
 0x122   :  { %663 = vmatprep.subr.bf16.mxu1 %v776_v0 }
 0x125   :  { %665 = vmatpush3.bf16.msra.mxu1 %v664_v7 }
 0x126   :  { %666 = vmatprep.subr.bf16.mxu1 %v776_v0 }
 0x129   :  { %668 = vmatpush3.bf16.msra.mxu1 %v667_v10 }
 0x12a   :  { %669 = vmatprep.subr.bf16.mxu1 %v776_v0 }
 0x12d   :  { %671 = vmatpush3.bf16.msra.mxu1 %v670_v13 }
 0x12e   :  { %672 = vmatprep.subr.bf16.mxu1 %v776_v0 }
 0x131   :  { %674 = vmatpush3.bf16.msra.mxu1 %v673_v16 }
 0x132   :  { %675 = vmatprep.subr.bf16.mxu1 %v776_v0 }
 0x135   :  { %677 = vmatpush3.bf16.msra.mxu1 %v676_v19 }
 0x136   :  { %678 = vmatprep.subr.bf16.mxu1 %v776_v0 }
 0x139   :  { %680 = vmatpush3.bf16.msra.mxu1 %v679_v27 }
 0x1ed   :  { %v217_v21 = vpop.f32.mrb[0].mxu1 }
 0x1ee   :  { %v218_v22 = vadd.f32 %v428_v20, %v217_v21  ;;  %v532_v23 = vpop.f32.mrb[1].mxu1 }
 0x1f0   :  { %693 = vtanh.f32 %v218_v22 }
 0x1fa   :  { %v694_v24 = vpop.eup %693 }
 0x1fb   :  { %566 = vmatmul.mubr.f32.vlgmr.msra.gmra.mrb[2].mxu0 %v694_v24 }
 0x2ce   :  { %v310_v29 = vpop.f32.mrb[2].mxu0 }
 0x2cf   :  { %v311_v0 = vadd.f32 %v429_v28, %v310_v29  ;;  %v567_v30 = vpop.f32.mrb[3].mxu0 }
 0x2d1   :  { %v314_v31 = vmax.f32 %v311_v0, 0.0 }
 0x2d3   :  { %601 = vmatmul.mubr.f32.vlgmr.msra.gmra.mrb[2].mxu1 %v314_v31 }
 0x3a6   :  { %v403_v33 = vpop.f32.mrb[2].mxu1 }
 0x3a7   :  { %v404_v34 = vadd.f32 %v430_v32, %v403_v33  ;;  %v602_v35 = vpop.f32.mrb[3].mxu1 }
 0x3a9   :  { %407 = vst [vmem:[#allocation7] sm:$0xff] %v404_v34 }
 0x3aa   :  { %412 = vsyncadd [#allocation4], 96  ;;  %s779_s19 = smov [#allocation7]  }
 0x3ab   :  { %s413_s20 = sshll.u32 %s779_s19, 4  ;;  %s414_s20 = int_to_ptr.vmem [resolvable:$true] %s413_s20 }
 0x3ac   :  { %s742_s21 = scalar_lea.vmem %s414_s20, 32  ;;  %s746_s22 = scalar_lea.vmem %s414_s20, 128 }
 0x3ad   :  { %p743_p6 = scmp.ne.s32.totalorder %s414_s20, %s742_s21  ;;  %p747_p7 = scmp.lt.s32.totalorder %s414_s20, %s414_s20 }
 0x3ae   :  { %p748_p8 = scmp.lt.s32.totalorder %s746_s22, %s742_s21 }
 0x3b0   :  { %p749_p9 = por %p748_p8, %p747_p7 }
 0x3b2   :  { %p750_p10 = pnand %p749_p9, %p743_p6 }
 0x3b4   :  { %753 = shalt.err (!%p750_p10)
}
 0x3b5   :  { %s754_s2 = scalar_lea.hbm %s888_s3, 32 }
 0x3b6   :  { %p755_p11 = scmp.ne.s32.totalorder %s888_s3, %s754_s2  ;;  %p758_p12 = scmp.lt.u32.totalorder %s754_s2, %s888_s3 }
 0x3b8   :  { %p760_p13 = pnand %p758_p12, %p755_p11 }
 0x3ba   :  { %763 = shalt.err (!%p760_p13)
}
 0x3bb   :  { %419 = dma.vmem_to_hbm [thread:$0]  %s414_s20, 32, %s888_s3, [#allocation4], %s771_s24, %s771_s24, %s772_s25  }
 0x3bc   :  { %768 = dma.done.wait [#allocation4], 128  }
 0x3bd   :  { %769 = vsyncadd [#allocation4], 4294967168 }
 0x3be   :  { %423 = vsyncpa [#allocation3], 1 }
 0x3bf   :  { %424 = vsyncpa [#allocation6], 1 }
 0x3c0   :  { %425 = vsyncpa [#allocation4], 1 }

</bundles_post_ra>
